<compile_context>
chip_gen: v7x
topology: tpu7x:2x2x1
jax: 0.10.0
libtpu: 0.0.40
codegen_flags: <defaults>
</compile_context>

<pallas_src>
import functools

import jax
import jax.numpy as jnp
from jax.experimental import pallas as pl
from jax.experimental.pallas import tpu as pltpu


BLK = 128      # lane-aligned column block per linear layer
KPAD = 128     # row (fan-in) padding of every packed weight block


def _softplus(x):
    # PyTorch nn.Softplus (beta=1, threshold=20): x if x > 20 else log(1 + exp(x))
    safe = jnp.minimum(x, 20.0)
    return jnp.where(x > 20.0, x, jnp.log1p(jnp.exp(safe)))


def fcnet_kernel(x_ref, w_ref, b_ref, out_ref, *, state_dim, num_hidden, action_dim):
    """One fused forward pass over a batch tile.

    x_ref   : [TM, state_dim]                 (f32 or bf16)
    w_ref   : [KPAD, BLK * (num_hidden + 1)]  packed weights; layer li lives in columns
                                              [li*BLK, (li+1)*BLK); rows beyond the layer's
                                              true fan-in and columns beyond its true
                                              fan-out are zero.
    b_ref   : [1, BLK * (num_hidden + 1)]     packed biases (f32), zero-padded the same way.
    out_ref : [TM, 2*action_dim]              = concat(mu, std) along lanes.
    """
    n_lin = num_hidden + 1
    h = x_ref[...]                                    # [TM, state_dim] (layer-0 operand)

    for li in range(n_lin):
        off = li * BLK                                # lane-aligned: slices are whole-vreg views
        if li == 0:
            w = w_ref[0:state_dim, off:off + BLK]     # sublane-aligned row slice for layer 0
        else:
            w = w_ref[:, off:off + BLK]               # full 128-row block (zero rows are inert)
        z = jnp.dot(h, w, preferred_element_type=jnp.float32) + b_ref[:, off:off + BLK]
        if li < n_lin - 1:
            # Hidden layer: ReLU, kept in f32 (activations never leave VMEM; no bf16 recast).
            # Padded lanes stay exactly 0 (zero weight columns + zero bias), so the zero
            # weight rows of the next block make them inert.
            h = jnp.maximum(z, 0.0)
        else:
            # Fused head: first action_dim lanes -> mu, next action_dim lanes -> sigma.
            mu = 2.0 * jnp.tanh(z[:, 0:action_dim])
            std = _softplus(z[:, action_dim:2 * action_dim])
            out_ref[...] = jnp.concatenate([mu, std], axis=-1).astype(out_ref.dtype)
    # TODO(synk): if the store/writeback ever shows up in a profile, present a lane-dense
    # (B//8, 128) output view instead of the 16-lane-wide block (secondary to the fixes above).


def _round_up(v, m):
    return ((v + m - 1) // m) * m


def _pick_tile(batch):
    """Batch-tile (TM) selection.

    * Big tiles amortize the ~0.35us fixed per-grid-step overhead (dominant cost here).
    * For mid-size batches, force >= 2 grid steps so the "parallel" axis can shard across
      both v7x TensorCores (nearly free on v5e/v6e at these sizes).
    * Tiny batches stay a single step: one step is strictly cheapest there.
    """
    pref_tm = 4096
    min_split = 256
    if batch <= min_split:
        return batch                      # one tile; block == full dim is always legal
    if batch <= 2 * pref_tm:
        return min(pref_tm, max(8, _round_up(pl.cdiv(batch, 2), 8)))   # nb == 2
    return pref_tm


@functools.partial(jax.jit,
                   static_argnames=("state_dim", "num_hidden", "action_dim", "out_dtype"))
def fcnet_forward(x, w_pack, b_pack, *, state_dim, num_hidden, action_dim,
                  out_dtype=jnp.float32):
    """x: [B, state_dim]. w_pack/b_pack from pack_params(). Returns (mu, std), [B, action_dim] each."""
    B = x.shape[0]
    n_out = 2 * action_dim
    kpad, n_total = w_pack.shape

    # Input DMA follows the weight dtype (bf16 weights => bf16 x, halving input HBM traffic).
    x = x.astype(w_pack.dtype)

    TM = _pick_tile(B)
    nb = pl.cdiv(B, TM)

    kernel = functools.partial(
        fcnet_kernel, state_dim=state_dim, num_hidden=num_hidden, action_dim=action_dim)

    cost = pl.CostEstimate(
        flops=2 * B * KPAD * n_total,                     # padded matmul flops (advisory)
        transcendentals=3 * B * action_dim,               # tanh + exp + log1p
        bytes_accessed=int(x.size * x.dtype.itemsize
                           + w_pack.size * w_pack.dtype.itemsize
                           + b_pack.size * 4
                           + B * n_out * jnp.dtype(out_dtype).itemsize),
    )

    out = pl.pallas_call(
        kernel,
        out_shape=jax.ShapeDtypeStruct((B, n_out), out_dtype),
        grid_spec=pltpu.PrefetchScalarGridSpec(
            num_scalar_prefetch=0,
            grid=(nb,),
            in_specs=[
                pl.BlockSpec((TM, x.shape[1]), lambda i: (i, 0)),   # batch-tiled activations
                pl.BlockSpec((kpad, n_total), lambda i: (0, 0)),    # packed weights (resident)
                pl.BlockSpec((1, n_total), lambda i: (0, 0)),       # packed biases  (resident)
            ],
            out_specs=pl.BlockSpec((TM, n_out), lambda i: (i, 0)),  # single fused mu|std output
        ),
        compiler_params=pltpu.CompilerParams(
            dimension_semantics=("parallel",),            # megacore / dual-TC sharding
            vmem_limit_bytes=32 * 1024 * 1024,            # stay inside v7x's 64 MiB VMEM
        ),
        cost_estimate=cost,
    )(x, w_pack, b_pack)

    return out[:, :action_dim], out[:, action_dim:]


def init_params(key, state_dim, hidden, action_dim):
    """Deterministic init mimicking nn.Linear's uniform(-1/sqrt(fan_in), 1/sqrt(fan_in)).
    Weights stored as [in, out] (transposed vs PyTorch)."""
    params = {}
    dims = [state_dim] + list(hidden)
    keys = jax.random.split(key, 2 * (len(hidden) + 2))
    ki = 0

    def linear(kw, kb, fan_in, fan_out):
        bound = 1.0 / (fan_in ** 0.5)
        w = jax.random.uniform(kw, (fan_in, fan_out), jnp.float32, -bound, bound)
        b = jax.random.uniform(kb, (1, fan_out), jnp.float32, -bound, bound)
        return w, b

    for i in range(len(hidden)):
        w, b = linear(keys[ki], keys[ki + 1], dims[i], dims[i + 1])
        ki += 2
        params[f"w{i}"], params[f"b{i}"] = w, b

    params["wmu"], params["bmu"] = linear(keys[ki], keys[ki + 1], hidden[-1], action_dim)
    ki += 2
    params["wsig"], params["bsig"] = linear(keys[ki], keys[ki + 1], hidden[-1], action_dim)
    return params


def pack_params(params, state_dim, hidden, action_dim, dtype=jnp.float32):
    """Pack all linears into one weight buffer + one bias buffer (done ONCE, not per call).

    Column layout: [hidden0 | hidden1 | ... | mu,sigma fused head], each block padded to a
    full 128-lane column block (zero columns) and 128 rows (zero rows), so the packed
    buffers are [128, 128*n_linear] / [1, 128*n_linear] and every in-kernel slice lands on
    a vreg boundary.
    """
    in_dims = (state_dim,) + tuple(hidden)
    out_dims = tuple(hidden) + (2 * action_dim,)
    assert max(in_dims) <= KPAD and max(out_dims) <= BLK, "layer widths must fit one 128 block"

    w_blocks = [params[f"w{i}"] for i in range(len(hidden))]
    b_blocks = [params[f"b{i}"] for i in range(len(hidden))]
    w_blocks.append(jnp.concatenate([params["wmu"], params["wsig"]], axis=1))
    b_blocks.append(jnp.concatenate([params["bmu"], params["bsig"]], axis=1))

    w_padded = [jnp.pad(w, ((0, KPAD - w.shape[0]), (0, BLK - w.shape[1]))) for w in w_blocks]
    b_padded = [jnp.pad(b, ((0, 0), (0, BLK - b.shape[1]))) for b in b_blocks]

    w_pack = jnp.concatenate(w_padded, axis=1).astype(dtype)        # [128, 128*n_linear]
    b_pack = jnp.concatenate(b_padded, axis=1).astype(jnp.float32)  # [1,   128*n_linear] (f32)
    return w_pack, b_pack


def reference_forward(x, params, num_hidden):
    h = x
    for i in range(num_hidden):
        h = jnp.maximum(h @ params[f"w{i}"] + params[f"b{i}"], 0.0)
    mu = 2.0 * jnp.tanh(h @ params["wmu"] + params["bmu"])
    std = jax.nn.softplus(h @ params["wsig"] + params["bsig"])
    return mu, std


if __name__ == "__main__":
    key = jax.random.PRNGKey(0)
    k_x, k_x2, k_p = jax.random.split(key, 3)

    batch = 8
    state_dim = 16
    hidden = (32, 32)      # actor_param_list = [32, 32]
    action_dim = 8
    num_hidden = len(hidden)

    x = jax.random.normal(k_x, (batch, state_dim), jnp.float32)
    params = init_params(k_p, state_dim, hidden, action_dim)

    # ---- float32 path (faithful to the PyTorch module semantics) ----
    w_pack, b_pack = pack_params(params, state_dim, hidden, action_dim, dtype=jnp.float32)
    mu, std = fcnet_forward(x, w_pack, b_pack, state_dim=state_dim,
                            num_hidden=num_hidden, action_dim=action_dim)
    jax.block_until_ready((mu, std))

    mu_ref, std_ref = reference_forward(x, params, num_hidden)
    assert jnp.allclose(mu, mu_ref, atol=1e-4, rtol=1e-4)
    assert jnp.allclose(std, std_ref, atol=1e-4, rtol=1e-4)
    assert bool(jnp.all(std > 0.0))

    # ---- multi-step grid path (exercises batch tiling + partial last block masking) ----
    x_big = jax.random.normal(k_x2, (300, state_dim), jnp.float32)
    mu_b, std_b = fcnet_forward(x_big, w_pack, b_pack, state_dim=state_dim,
                                num_hidden=num_hidden, action_dim=action_dim)
    jax.block_until_ready((mu_b, std_b))
    mu_b_ref, std_b_ref = reference_forward(x_big, params, num_hidden)
    assert jnp.allclose(mu_b, mu_b_ref, atol=1e-4, rtol=1e-4)
    assert jnp.allclose(std_b, std_b_ref, atol=1e-4, rtol=1e-4)

    # ---- bf16-operand / f32-accumulate path (v6e / v7x MXU fast path) ----
    w_pack_bf, b_pack_bf = pack_params(params, state_dim, hidden, action_dim, dtype=jnp.bfloat16)
    mu_bf, std_bf = fcnet_forward(x, w_pack_bf, b_pack_bf, state_dim=state_dim,
                                  num_hidden=num_hidden, action_dim=action_dim)
    jax.block_until_ready((mu_bf, std_bf))

    # Reference with EXACTLY the kernel's quantization: only weights and the input are
    # rounded to bf16; intermediate activations stay f32 in both kernel and reference.
    params_rt = {k: (v.astype(jnp.bfloat16).astype(jnp.float32) if k.startswith("w") else v)
                 for k, v in params.items()}
    x_rt = x.astype(jnp.bfloat16).astype(jnp.float32)
    mu_ref_bf, std_ref_bf = reference_forward(x_rt, params_rt, num_hidden)
    assert jnp.allclose(mu_bf, mu_ref_bf, atol=1e-2, rtol=1e-2)
    assert jnp.allclose(std_bf, std_ref_bf, atol=1e-2, rtol=1e-2)
    assert bool(jnp.all(std_bf > 0.0))

    print("KERNEL_OK")
</pallas_src>

<mosaic_0001>
module attributes {stable_mosaic.version = 11 : i64} {
  func.func @fcnet_kernel(%arg0: i32, %arg1: memref<8x16xf32, #tpu.memory_space<vmem>>, %arg2: memref<128x384xf32, #tpu.memory_space<vmem>>, %arg3: memref<1x384xf32, #tpu.memory_space<vmem>>, %arg4: memref<8x16xf32, #tpu.memory_space<vmem>>) attributes {dimension_semantics = [#tpu.dimension_semantics<parallel>], iteration_bounds = array<i64: 1>, scalar_prefetch = 0 : i64, scratch_operands = 0 : i64, tpu.core_type = #tpu.core_type<tc>, window_params = [{transform_indices = @transform_0, window_bounds = array<i64: 8, 16>}, {pipeline_mode = #tpu.pipeline_mode<synchronous>, transform_indices = @transform_1, window_bounds = array<i64: 128, 384>}, {pipeline_mode = #tpu.pipeline_mode<synchronous>, transform_indices = @transform_2, window_bounds = array<i64: 1, 384>}, {transform_indices = @transform_3, window_bounds = array<i64: 8, 16>}]} {
    %c0 = arith.constant 0 : index
    %c0_0 = arith.constant 0 : index
    %0 = vector.load %arg1[%c0, %c0_0] : memref<8x16xf32, #tpu.memory_space<vmem>>, vector<8x16xf32>
    %c0_1 = arith.constant 0 : index
    %c0_2 = arith.constant 0 : index
    %1 = vector.load %arg2[%c0_1, %c0_2] : memref<128x384xf32, #tpu.memory_space<vmem>>, vector<16x128xf32>
    %cst = arith.constant dense<0.000000e+00> : vector<8x128xf32>
    %2 = tpu.matmul %0, %1, %cst {dimension_numbers = #tpu.dot_dimension_numbers<[1], [0], [0], [1], [0, 0, 1, 1], [], []>} : vector<8x16xf32>, vector<16x128xf32>, vector<8x128xf32> -> vector<8x128xf32>
    %c0_3 = arith.constant 0 : index
    %c0_4 = arith.constant 0 : index
    %3 = vector.load %arg3[%c0_3, %c0_4] : memref<1x384xf32, #tpu.memory_space<vmem>>, vector<1x128xf32>
    %4 = vector.broadcast %3 : vector<1x128xf32> to vector<8x128xf32>
    %5 = arith.addf %2, %4 : vector<8x128xf32>
    %cst_5 = arith.constant 0.000000e+00 : f32
    %6 = vector.broadcast %cst_5 : f32 to vector<8x128xf32>
    %7 = arith.maximumf %5, %6 : vector<8x128xf32>
    %c0_6 = arith.constant 0 : index
    %c128 = arith.constant 128 : index
    %8 = vector.load %arg2[%c0_6, %c128] : memref<128x384xf32, #tpu.memory_space<vmem>>, vector<128x128xf32>
    %cst_7 = arith.constant dense<0.000000e+00> : vector<8x128xf32>
    %9 = tpu.matmul %7, %8, %cst_7 {dimension_numbers = #tpu.dot_dimension_numbers<[1], [0], [0], [1], [0, 0, 1, 1], [], []>} : vector<8x128xf32>, vector<128x128xf32>, vector<8x128xf32> -> vector<8x128xf32>
    %c0_8 = arith.constant 0 : index
    %c128_9 = arith.constant 128 : index
    %10 = vector.load %arg3[%c0_8, %c128_9] : memref<1x384xf32, #tpu.memory_space<vmem>>, vector<1x128xf32>
    %11 = vector.broadcast %10 : vector<1x128xf32> to vector<8x128xf32>
    %12 = arith.addf %9, %11 : vector<8x128xf32>
    %cst_10 = arith.constant 0.000000e+00 : f32
    %13 = vector.broadcast %cst_10 : f32 to vector<8x128xf32>
    %14 = arith.maximumf %12, %13 : vector<8x128xf32>
    %c0_11 = arith.constant 0 : index
    %c256 = arith.constant 256 : index
    %15 = vector.load %arg2[%c0_11, %c256] : memref<128x384xf32, #tpu.memory_space<vmem>>, vector<128x128xf32>
    %cst_12 = arith.constant dense<0.000000e+00> : vector<8x128xf32>
    %16 = tpu.matmul %14, %15, %cst_12 {dimension_numbers = #tpu.dot_dimension_numbers<[1], [0], [0], [1], [0, 0, 1, 1], [], []>} : vector<8x128xf32>, vector<128x128xf32>, vector<8x128xf32> -> vector<8x128xf32>
    %c0_13 = arith.constant 0 : index
    %c256_14 = arith.constant 256 : index
    %17 = vector.load %arg3[%c0_13, %c256_14] : memref<1x384xf32, #tpu.memory_space<vmem>>, vector<1x128xf32>
    %18 = vector.broadcast %17 : vector<1x128xf32> to vector<8x128xf32>
    %19 = arith.addf %16, %18 : vector<8x128xf32>
    %20 = vector.extract_strided_slice %19 {offsets = [0, 0], sizes = [8, 8], strides = [1, 1]} : vector<8x128xf32> to vector<8x8xf32>
    %21 = math.tanh %20 : vector<8x8xf32>
    %cst_15 = arith.constant 2.000000e+00 : f32
    %22 = vector.broadcast %cst_15 : f32 to vector<8x8xf32>
    %23 = arith.mulf %22, %21 : vector<8x8xf32>
    %24 = vector.extract_strided_slice %19 {offsets = [0, 8], sizes = [8, 8], strides = [1, 1]} : vector<8x128xf32> to vector<8x8xf32>
    %cst_16 = arith.constant 2.000000e+01 : f32
    %25 = vector.broadcast %cst_16 : f32 to vector<8x8xf32>
    %26 = arith.minimumf %24, %25 : vector<8x8xf32>
    %cst_17 = arith.constant 2.000000e+01 : f32
    %27 = vector.broadcast %cst_17 : f32 to vector<8x8xf32>
    %28 = arith.cmpf ogt, %24, %27 : vector<8x8xf32>
    %29 = math.exp %26 : vector<8x8xf32>
    %30 = math.log1p %29 : vector<8x8xf32>
    %31 = arith.select %28, %24, %30 : vector<8x8xi1>, vector<8x8xf32>
    %32 = tpu.concatenate %23, %31 in 1 : vector<8x8xf32>, vector<8x8xf32> -> vector<8x16xf32>
    %c0_18 = arith.constant 0 : index
    %c0_19 = arith.constant 0 : index
    %33 = vector.load %arg4[%c0_18, %c0_19] : memref<8x16xf32, #tpu.memory_space<vmem>>, vector<8x16xf32>
    tpu.vector_store %arg4[%c0_18, %c0_19], %32 {strides = array<i32>} : memref<8x16xf32, #tpu.memory_space<vmem>>, vector<8x16xf32>,
    return
  }
  func.func @transform_0(%arg0: i32) -> (i32, i32) {
    %c0_i32 = arith.constant 0 : i32
    %c0_i32_0 = arith.constant 0 : i32
    return %arg0, %c0_i32 : i32, i32
  }
  func.func @transform_1(%arg0: i32) -> (i32, i32) {
    %c0_i32 = arith.constant 0 : i32
    %c0_i32_0 = arith.constant 0 : i32
    %c0_i32_1 = arith.constant 0 : i32
    return %c0_i32, %c0_i32_0 : i32, i32
  }
  func.func @transform_2(%arg0: i32) -> (i32, i32) {
    %c0_i32 = arith.constant 0 : i32
    %c0_i32_0 = arith.constant 0 : i32
    %c0_i32_1 = arith.constant 0 : i32
    return %c0_i32, %c0_i32_0 : i32, i32
  }
  func.func @transform_3(%arg0: i32) -> (i32, i32) {
    %c0_i32 = arith.constant 0 : i32
    %c0_i32_0 = arith.constant 0 : i32
    return %arg0, %c0_i32 : i32, i32
  }
}

</mosaic_0001>

<bundles_post_ra>
// kernel: fcnet_forward.1
= control target key start
LH: loop header
LB: loop body
LE: loop exit
PB: predicated region body
PF: predicated region fallthrough
CT: control target
= control target key end

     0   :  { %8 = vsyncpa [#allocation3], 0  ;;  %s659_s0 = inlined_call_operand.hbm [shape: f32[8,16], index: 0, kind: input, shape index: {}]   ;;  %s660_s1 = inlined_call_operand.hbm [shape: f32[128,384], index: 1, kind: input, shape index: {}]   ;;  %s661_s2 = inlined_call_operand.vmem [shape: f32[1,384], index: 2, kind: input, shape index: {}]   ;;  %s662_s3 = inlined_call_operand.vmem [shape: f32[8,16], index: 3, kind: output, shape index: {}]  }
   0x1   :  { %9 = vsyncpa [#allocation5], 0  ;;  %s567_s12 = smov [#allocation2]   ;;  %s568_s14 = smov [#allocation4]  }
   0x2   :  { %s16_s13 = sshll.u32 %s567_s12, 4  ;;  %s25_s15 = sshll.u32 %s568_s14, 4  ;;  %s17_s13 = int_to_ptr.vmem [resolvable:$true] %s16_s13  ;;  %s594_s15 = int_to_ptr.vmem [resolvable:$true] %s25_s15 }
   0x3   :  { %s519_s18 = scalar_lea.hbm %s659_s0, 128 }
   0x4   :  { %p520_p0 = scmp.ne.s32.totalorder %s659_s0, %s519_s18  ;;  %p523_p1 = scmp.lt.u32.totalorder %s519_s18, %s659_s0 }
   0x6   :  { %p525_p2 = pnand %p523_p1, %p520_p0 }
   0x8   :  { %528 = shalt.err (!%p525_p2)
}
   0x9   :  { %s529_s23 = scalar_lea.vmem %s17_s13, 128  ;;  %p534_p4 = scmp.lt.s32.totalorder %s17_s13, %s17_s13 }
   0xa   :  { %p530_p3 = scmp.ne.s32.totalorder %s17_s13, %s529_s23  ;;  %p535_p5 = scmp.lt.s32.totalorder %s529_s23, %s529_s23 }
   0xc   :  { %p536_p6 = por %p535_p5, %p534_p4 }
   0xe   :  { %p537_p7 = pnand %p536_p6, %p530_p3 }
  0x10   :  { %540 = shalt.err (!%p537_p7)
}
  0x11   :  { %19 = dma.hbm_to_vmem [thread:$0]  %s659_s0, 128, %s17_s13, [#allocation3]  }
  0x12   :  { %s541_s28 = scalar_lea.hbm %s660_s1, 6144 }
  0x13   :  { %p542_p8 = scmp.ne.s32.totalorder %s660_s1, %s541_s28  ;;  %p545_p9 = scmp.lt.u32.totalorder %s541_s28, %s660_s1 }
  0x15   :  { %p547_p10 = pnand %p545_p9, %p542_p8 }
  0x17   :  { %550 = shalt.err (!%p547_p10)
}
  0x18   :  { %s551_s6 = scalar_lea.vmem %s594_s15, 6144  ;;  %p556_p12 = scmp.lt.s32.totalorder %s594_s15, %s594_s15 }
  0x19   :  { %p552_p11 = scmp.ne.s32.totalorder %s594_s15, %s551_s6  ;;  %p557_p13 = scmp.lt.s32.totalorder %s551_s6, %s551_s6 }
  0x1b   :  { %p558_p0 = por %p557_p13, %p556_p12 }
  0x1d   :  { %p559_p1 = pnand %p558_p0, %p552_p11 }
  0x1f   :  { %562 = shalt.err (!%p559_p1)
}
  0x20   :  { %s569_s0 = smov 384   ;;  %s570_s7 = smov 24  }
  0x21   :  { %31 = dma.hbm_to_vmem [thread:$0]  %s660_s1, 6144, %s594_s15, [#allocation5], %s569_s0, %s569_s0, %s570_s7  }
  0x22   :  { %563 = dma.done.wait [#allocation3], 128  }
  0x23   :  { %564 = vsyncadd [#allocation3], 4294967168 }
  0x24   :  { %565 = dma.done.wait [#allocation5], 6144  }
  0x25   :  { %566 = vsyncadd [#allocation5], 4294961152  ;;  %v571_v0 = vmov 0.0|0.0   ;;  %vm572_vm0 = vmmov 0   ;;  %v573_v1 = vmov 0.0   ;;  %v41_v2 = vld [vmem:[#allocation4] sm:$0xff] }
  0x26   :  { %455 = vmatprep.subr.bf16.mxu0 %v571_v0  ;;  %382 = vmatprep.mubr.msk.f32.mxu0 %vm572_vm0, %v573_v1  ;;  %v42_v3 = vld [vmem:[#allocation4 + $0x18] sm:$0xff]  ;;  %v125_v5 = vld [vmem:[#allocation4 + $0x8] sm:$0xff]  ;;  %v126_v6 = vld [vmem:[#allocation4 + $0x20] sm:$0xff]  ;;  %vm50_vm1 = vcmask 130048   ;;  %vm328_vm3 = vcmask 64512  }
  0x27   :  { %458 = vmatprep.subr.bf16.mxu1 %v571_v0  ;;  %417 = vmatprep.mubr.msk.f32.mxu1 %vm572_vm0, %v573_v1  ;;  %v456_v4 = vpack.c.bf16 %v42_v3, %v41_v2  ;;  %v127_v7 = vld [vmem:[#allocation4 + $0x38] sm:$0xff]  ;;  %v459_v8 = vpack.c.bf16 %v126_v6, %v125_v5  ;;  %v128_v9 = vld [vmem:[#allocation4 + $0x50] sm:$0xff]  ;;  %v129_v12 = vld [vmem:[#allocation4 + $0x68] sm:$0xff] }
  0x28   :  { %v40_v10 = vld [vmem:[#allocation2] sm:$0xff]  ;;  %v462_v11 = vpack.c.bf16 %v128_v9, %v127_v7  ;;  %v130_v13 = vld [vmem:[#allocation4 + $0x80] sm:$0xff]  ;;  %v132_v16 = vld [vmem:[#allocation4 + $0xb0] sm:$0xff] }
  0x29   :  { %457 = vmatpush3.bf16.msra.mxu0 %v456_v4  ;;  %460 = vmatpush3.bf16.msra.mxu1 %v459_v8  ;;  %v465_v14 = vpack.c.bf16 %v130_v13, %v129_v12  ;;  %v131_v15 = vld [vmem:[#allocation4 + $0x98] sm:$0xff]  ;;  %v133_v18 = vld [vmem:[#allocation4 + $0xc8] sm:$0xff]  ;;  %v134_v19 = vld [vmem:[#allocation4 + $0xe0] sm:$0xff] }
  0x2a   :  { %482 = vmatprep.subr.bf16.mxu0 %v571_v0  ;;  %461 = vmatprep.subr.bf16.mxu1 %v571_v0  ;;  %v468_v17 = vpack.c.bf16 %v132_v16, %v131_v15  ;;  %v471_v20 = vpack.c.bf16 %v134_v19, %v133_v18  ;;  %v135_v21 = vld [vmem:[#allocation4 + $0xf8] sm:$0xff]  ;;  %v136_v22 = vld [vmem:[#allocation4 + $0x110] sm:$0xff]  ;;  %v137_v24 = vld [vmem:[#allocation4 + $0x128] sm:$0xff] }
  0x2b   :  { %v474_v23 = vpack.c.bf16 %v136_v22, %v135_v21  ;;  %v138_v25 = vld [vmem:[#allocation4 + $0x140] sm:$0xff]  ;;  %v139_v27 = vld [vmem:[#allocation4 + $0x158] sm:$0xff]  ;;  %v140_v28 = vld [vmem:[#allocation4 + $0x170] sm:$0xff] }
  0x2c   :  { %383 = vmatmul.mubr.msk.f32.vlgmr.msra.gmra.mrb[0].mxu0 %vm50_vm1, %v40_v10  ;;  %v477_v26 = vpack.c.bf16 %v138_v25, %v137_v24  ;;  %v480_v29 = vpack.c.bf16 %v140_v28, %v139_v27  ;;  %v219_v30 = vld [vmem:[#allocation4 + $0x10] sm:$0xff]  ;;  %v220_v31 = vld [vmem:[#allocation4 + $0x28] sm:$0xff]  ;;  %v221_v32 = vld [vmem:[#allocation4 + $0x40] sm:$0xff] }
  0x2d   :  { %452 = vmatprep.mubr.msk.f32.mxu0 %vm572_vm0, %v573_v1  ;;  %463 = vmatpush3.bf16.msra.mxu1 %v462_v11  ;;  %v483_v33 = vpack.c.bf16 %v220_v31, %v219_v30  ;;  %v222_v34 = vld [vmem:[#allocation4 + $0x58] sm:$0xff]  ;;  %v223_v36 = vld [vmem:[#allocation4 + $0x70] sm:$0xff]  ;;  %v224_v37 = vld [vmem:[#allocation4 + $0x88] sm:$0xff] }
  0x2e   :  { %464 = vmatprep.subr.bf16.mxu1 %v571_v0  ;;  %v486_v35 = vpack.c.bf16 %v222_v34, %v221_v32  ;;  %v489_v38 = vpack.c.bf16 %v224_v37, %v223_v36  ;;  %v225_v39 = vld [vmem:[#allocation4 + $0xa0] sm:$0xff]  ;;  %v226_v40 = vld [vmem:[#allocation4 + $0xb8] sm:$0xff]  ;;  %v227_v42 = vld [vmem:[#allocation4 + $0xd0] sm:$0xff] }
  0x2f   :  { %484 = vmatpush3.bf16.msra.mxu0 %v483_v33  ;;  %v492_v41 = vpack.c.bf16 %v226_v40, %v225_v39  ;;  %v228_v43 = vld [vmem:[#allocation4 + $0xe8] sm:$0xff]  ;;  %v229_v45 = vld [vmem:[#allocation4 + $0x100] sm:$0xff]  ;;  %v230_v46 = vld [vmem:[#allocation4 + $0x118] sm:$0xff] }
  0x30   :  { %485 = vmatprep.subr.bf16.mxu0 %v571_v0  ;;  %v495_v44 = vpack.c.bf16 %v228_v43, %v227_v42  ;;  %v498_v47 = vpack.c.bf16 %v230_v46, %v229_v45  ;;  %v231_v48 = vld [vmem:[#allocation4 + $0x130] sm:$0xff]  ;;  %v232_v49 = vld [vmem:[#allocation4 + $0x148] sm:$0xff]  ;;  %v233_v56 = vld [vmem:[#allocation4 + $0x160] sm:$0xff] }
  0x31   :  { %466 = vmatpush3.bf16.msra.mxu1 %v465_v14  ;;  %v501_v50 = vpack.c.bf16 %v232_v49, %v231_v48  ;;  %v337_v51 = vld [vmem:[%s661_s2] ss:$0 sm:$0xff]  ;;  %v234_v57 = vld [vmem:[#allocation4 + $0x178] sm:$0xff]  ;;  %v339_v59 = vld [vmem:[%s661_s2 + $0x1] ss:$0 sm:$0xff] }
  0x32   :  { %467 = vmatprep.subr.bf16.mxu1 %v571_v0  ;;  %v504_v58 = vpack.c.bf16 %v234_v57, %v233_v56 }
  0x33   :  { %487 = vmatpush3.bf16.msra.mxu0 %v486_v35 }
  0x34   :  { %488 = vmatprep.subr.bf16.mxu0 %v571_v0 }
  0x35   :  { %469 = vmatpush3.bf16.msra.mxu1 %v468_v17 }
  0x36   :  { %470 = vmatprep.subr.bf16.mxu1 %v571_v0 }
  0x37   :  { %490 = vmatpush3.bf16.msra.mxu0 %v489_v38 }
  0x38   :  { %491 = vmatprep.subr.bf16.mxu0 %v571_v0 }
  0x39   :  { %472 = vmatpush3.bf16.msra.mxu1 %v471_v20 }
  0x3a   :  { %473 = vmatprep.subr.bf16.mxu1 %v571_v0 }
  0x3b   :  { %493 = vmatpush3.bf16.msra.mxu0 %v492_v41 }
  0x3c   :  { %494 = vmatprep.subr.bf16.mxu0 %v571_v0 }
  0x3d   :  { %475 = vmatpush3.bf16.msra.mxu1 %v474_v23 }
  0x3e   :  { %476 = vmatprep.subr.bf16.mxu1 %v571_v0 }
  0x3f   :  { %496 = vmatpush3.bf16.msra.mxu0 %v495_v44 }
  0x40   :  { %497 = vmatprep.subr.bf16.mxu0 %v571_v0 }
  0x41   :  { %478 = vmatpush3.bf16.msra.mxu1 %v477_v26 }
  0x42   :  { %479 = vmatprep.subr.bf16.mxu1 %v571_v0 }
  0x43   :  { %499 = vmatpush3.bf16.msra.mxu0 %v498_v47 }
  0x44   :  { %500 = vmatprep.subr.bf16.mxu0 %v571_v0 }
  0x45   :  { %481 = vmatpush3.bf16.msra.mxu1 %v480_v29 }
  0x47   :  { %502 = vmatpush3.bf16.msra.mxu0 %v501_v50 }
  0x48   :  { %503 = vmatprep.subr.bf16.mxu0 %v571_v0  ;;  %v340_v0 = vld [vmem:[%s661_s2 + $0x2] ss:$0 sm:$0xff] }
  0x4b   :  { %505 = vmatpush3.bf16.msra.mxu0 %v504_v58 }
  0xff   :  { %v120_v52 = vpop.f32.mrb[0].mxu0 }
 0x100   :  { %v121_v53 = vadd.f32 %v337_v51, %v120_v52  ;;  %v384_v54 = vpop.f32.mrb[1].mxu0 }
 0x102   :  { %v124_v55 = vmax.f32 %v121_v53, 0.0 }
 0x104   :  { %418 = vmatmul.mubr.f32.vlgmr.msra.gmra.mrb[0].mxu1 %v124_v55 }
 0x1d7   :  { %v214_v60 = vpop.f32.mrb[0].mxu1 }
 0x1d8   :  { %v215_v61 = vadd.f32 %v339_v59, %v214_v60  ;;  %v419_v62 = vpop.f32.mrb[1].mxu1 }
 0x1da   :  { %v218_v63 = vmax.f32 %v215_v61, 0.0 }
 0x1dc   :  { %453 = vmatmul.mubr.f32.vlgmr.msra.gmra.mrb[2].mxu0 %v218_v63 }
 0x2af   :  { %v308_v1 = vpop.f32.mrb[2].mxu0 }
 0x2b0   :  { %v309_v2 = vadd.f32 %v340_v0, %v308_v1  ;;  %v454_v3 = vpop.f32.mrb[3].mxu0 }
 0x2b2   :  { %v314_v4 = vmin.f32 %v309_v2, 20.0  ;;  %vm315_vm4 = vcmp.gt.f32.partialorder %v309_v2, 20.0 }
 0x2b4   :  { %v316_v5 = vmul.f32 1.442695, %v314_v4 }
 0x2b6   :  { %513 = vpow2.f32 %v316_v5 }
 0x2b7   :  { %515 = vtanh.f32 %v309_v2 }
 0x2c0   :  { %v514_v6 = vpop.eup %513 }
 0x2c1   :  { %v318_v7 = vadd.f32 1.0, %v514_v6  ;;  %v321_v8 = vmul.f32 -0.5, %v514_v6  ;;  %v324_v10 = vand.u32 2147483647, %v514_v6  ;;  %v516_v11 = vpop.eup %515 }
 0x2c2   :  { %v313_v15 = vmul.f32 2.0, %v516_v11 }
 0x2c3   :  { %517 = vlog2.f32 %v318_v7  ;;  %v322_v9 = vadd.f32 1.0, %v321_v8  ;;  %vm325_vm2 = vcmp.lt.f32.partialorder %v324_v10, 0.0004427343 }
 0x2c5   :  { %v323_v14 = vmul.f32 %v514_v6, %v322_v9 }
 0x2cd   :  { %v518_v12 = vpop.eup %517 }
 0x2ce   :  { %v320_v13 = vmul.f32 0.6931472, %v518_v12 }
 0x2d0   :  { %v326_v16 = vsel %vm325_vm2, %v323_v14, %v320_v13 }
 0x2d1   :  { %v327_v17 = vsel %vm315_vm4, %v309_v2, %v326_v16 }
 0x2d2   :  { %v329_v18 = vsel %vm328_vm3, %v313_v15, %v327_v17 }
 0x2d3   :  { %330 = vst.msk [vmem:[%s662_s3] sm:$0xff] %vm50_vm1, %v329_v18 }
 0x2d4   :  { %335 = vsyncpa [#allocation3], 1 }
 0x2d5   :  { %336 = vsyncpa [#allocation5], 1 }

</bundles_post_ra>
